<compile_context>
chip_gen: v7x
topology: tpu7x:2x2x1
jax: 0.10.0
libtpu: 0.0.40
codegen_flags: <defaults>
</compile_context>

<pallas_src>
import math

import jax
import jax.numpy as jnp
from jax.experimental import pallas as pl
from jax.experimental.pallas import tpu as pltpu


# ---------------------------------------------------------------------------
# Kernels
# ---------------------------------------------------------------------------

def _dist_kernel_single_k(feat_ref, ct_ref, fnorm_ref, cnorm_ref, out_ref):
    """D fits in a single K tile: no accumulator, no pl.when."""
    cross = jnp.dot(feat_ref[...], ct_ref[...],
                    preferred_element_type=jnp.float32)
    dist = fnorm_ref[...] + cnorm_ref[...] - 2.0 * cross
    out_ref[...] = jnp.maximum(dist, 0.0).astype(out_ref.dtype)


def _dist_kernel_inplace(feat_ref, ct_ref, fnorm_ref, cnorm_ref, out_ref):
    """Multi-K, f32 output: the resident output block doubles as the f32
    accumulator (saves a (tb, tc) VMEM scratch + epilogue copy)."""
    k = pl.program_id(2)

    @pl.when(k == 0)
    def _():
        out_ref[...] = jnp.zeros_like(out_ref)

    out_ref[...] += jnp.dot(feat_ref[...], ct_ref[...],
                            preferred_element_type=jnp.float32)

    @pl.when(k == pl.num_programs(2) - 1)
    def _():
        dist = fnorm_ref[...] + cnorm_ref[...] - 2.0 * out_ref[...]
        out_ref[...] = jnp.maximum(dist, 0.0)


def _dist_kernel_acc(feat_ref, ct_ref, fnorm_ref, cnorm_ref, out_ref, acc_ref):
    """Multi-K, narrow output dtype: f32 scratch accumulator."""
    k = pl.program_id(2)

    @pl.when(k == 0)
    def _():
        acc_ref[...] = jnp.zeros_like(acc_ref)

    acc_ref[...] += jnp.dot(feat_ref[...], ct_ref[...],
                            preferred_element_type=jnp.float32)

    @pl.when(k == pl.num_programs(2) - 1)
    def _():
        dist = fnorm_ref[...] + cnorm_ref[...] - 2.0 * acc_ref[...]
        out_ref[...] = jnp.maximum(dist, 0.0).astype(out_ref.dtype)


# ---------------------------------------------------------------------------
# Tiling / config
# ---------------------------------------------------------------------------

def _round_up(x, m):
    return ((x + m - 1) // m) * m


def _balanced_tile(total, target, mult):
    """Tile size <= target (multiple of `mult`) minimizing padding of `total`.
    Returns (tile, padded_total) with padded_total % tile == 0."""
    total_p = _round_up(max(int(total), 1), mult)
    tgt = max(mult, _round_up(min(int(target), total_p), mult))
    n = -(-total_p // tgt)
    tile = _round_up(-(-total_p // n), mult)
    return tile, n * tile


def _physical_vmem_bytes():
    default = 64 << 20          # assume the tightest generation (v7x)
    try:
        info = pltpu.get_tpu_info()
        v = int(getattr(info, "vmem_capacity_bytes", 0) or 0)
        return v if v > 0 else default
    except Exception:
        return default


def _choose_config(B, C, D, in_bytes, out_bytes, vmem_bytes):
    """Pick (tb, tc, tk, Bp, Cp, Dp) so the double-buffered tiles fill most of
    physical VMEM: arithmetic intensity ~ tb*tc/(tb+tc) flop/byte must clear
    the HBM roofline (v5e ~240, v7x ~310, v6e ~655 for bf16)."""
    sub = max(8, 32 // in_bytes)             # sublane multiple for the dtype
    budget = int(vmem_bytes * 0.6)           # leave headroom for the compiler

    tb_t = min(1536, _round_up(B, sub))      # output-tile targets; no roofline
    tc_t = min(1536, _round_up(C, 128))      #  gain past ~1536 on any gen
    tk_t = 2048                              # big K tiles amortize acc RMW

    def usage(tb, tc, tk, nk):
        use_acc = (nk > 1) and (out_bytes != 4)
        u = 2 * tb * tk * in_bytes           # feat tile (double-buffered)
        u += 2 * tk * tc * in_bytes          # centers^T tile
        u += 2 * tb * 128 * 4                # f-norm tile (lane padded)
        u += 2 * 8 * tc * 4                  # c-norm tile (sublane padded)
        u += 2 * tb * tc * out_bytes         # output tile
        if use_acc:
            u += tb * tc * 4                 # f32 scratch accumulator
        return u

    while True:
        tb, Bp = _balanced_tile(B, tb_t, sub)
        tc, Cp = _balanced_tile(C, tc_t, 128)
        tk, Dp = _balanced_tile(D, tk_t, 128)
        nk = Dp // tk
        if usage(tb, tc, tk, nk) <= budget:
            break
        if tk_t > 512:                       # sacrifice K-tile size first
            tk_t = max(512, tk_t // 2)
        elif tc_t >= tb_t and tc_t > 128:    # then the larger output dim
            tc_t -= 128
        elif tb_t > 128:
            tb_t -= 128
        elif tc_t > 128:
            tc_t -= 128
        elif tk_t > 128:
            tk_t = max(128, tk_t // 2)
        elif tb_t > sub:
            tb_t = max(sub, tb_t - sub)
        else:
            break                            # minimal config

    # If everything fits a single tile, split C (or B) so the parallel grid
    # has >= 2 steps: v7x has two TensorCores, extra steps ~free elsewhere.
    if Bp // tb == 1 and Cp // tc == 1:
        tc2, Cp2 = _balanced_tile(C, max(128, tc // 2), 128)
        tb2, Bp2 = _balanced_tile(B, max(sub, tb // 2), sub)
        if Cp2 // tc2 >= 2:
            tc, Cp = tc2, Cp2
        elif Bp2 // tb2 >= 2:
            tb, Bp = tb2, Bp2

    return tb, tc, tk, Bp, Cp, Dp


# ---------------------------------------------------------------------------
# Wrapper
# ---------------------------------------------------------------------------

def centroid_euclidean_dist(feat, centers, *, compute_dtype=None):
    """dist[b, c] = sum_d (feat[b, d] - centers[c, d])**2.

    compute_dtype: optional narrower dtype (e.g. jnp.bfloat16) for the MXU
    operands; accumulation and norms stay f32, output keeps feat.dtype.
    """
    B, D = feat.shape
    C, Dc = centers.shape
    assert D == Dc, "feature dims must match"
    out_dtype = feat.dtype

    if compute_dtype is not None:
        feat = feat.astype(compute_dtype)
        centers = centers.astype(compute_dtype)
    in_bytes = jnp.dtype(feat.dtype).itemsize
    out_bytes = jnp.dtype(out_dtype).itemsize

    vmem_bytes = _physical_vmem_bytes()
    tb, tc, tk, Bp, Cp, Dp = _choose_config(B, C, D, in_bytes, out_bytes,
                                            vmem_bytes)
    nk = Dp // tk
    grid = (Bp // tb, Cp // tc, nk)

    # Zero padding: padded D contributes 0 to both norms and the dot product;
    # padded B / C rows are sliced off at the end.
    feat_p = jnp.pad(feat, ((0, Bp - B), (0, Dp - D))) \
        if (Bp, Dp) != (B, D) else feat
    centers_p = jnp.pad(centers, ((0, Cp - C), (0, Dp - D))) \
        if (Cp, Dp) != (C, D) else centers

    # Row norms (O((B+C)*D), negligible vs the matmul), f32, added in-kernel.
    f_norm = jnp.sum(jnp.square(feat_p.astype(jnp.float32)),
                     axis=-1, keepdims=True)               # (Bp, 1)
    c_norm = jnp.sum(jnp.square(centers_p.astype(jnp.float32)),
                     axis=-1)[None, :]                      # (1, Cp)

    # Pre-transpose once so the MXU contraction is the canonical
    # (tb, tk) @ (tk, tc) - no per-step in-kernel transpose of the RHS tile.
    centers_t = centers_p.T                                 # (Dp, Cp)

    if nk == 1:
        kernel = _dist_kernel_single_k
        scratch = ()
    elif jnp.dtype(out_dtype) == jnp.dtype(jnp.float32):
        kernel = _dist_kernel_inplace
        scratch = ()
    else:
        kernel = _dist_kernel_acc
        scratch = (pltpu.VMEM((tb, tc), jnp.float32),)

    out = pl.pallas_call(
        kernel,
        out_shape=jax.ShapeDtypeStruct((Bp, Cp), out_dtype),
        grid_spec=pltpu.PrefetchScalarGridSpec(
            num_scalar_prefetch=0,
            grid=grid,
            in_specs=[
                pl.BlockSpec((tb, tk), lambda i, j, k: (i, k)),   # feat
                pl.BlockSpec((tk, tc), lambda i, j, k: (k, j)),   # centers^T
                pl.BlockSpec((tb, 1), lambda i, j, k: (i, 0)),    # ||f||^2
                pl.BlockSpec((1, tc), lambda i, j, k: (0, j)),    # ||c||^2
            ],
            out_specs=pl.BlockSpec((tb, tc), lambda i, j, k: (i, j)),
            scratch_shapes=scratch,
        ),
        compiler_params=pltpu.CompilerParams(
            dimension_semantics=("parallel", "parallel", "arbitrary"),
            vmem_limit_bytes=int(vmem_bytes * 0.85),
        ),
    )(feat_p, centers_t, f_norm, c_norm)

    return out[:B, :C]


def init_centers(key, num_centers, feat_dim, dtype=jnp.float32):
    # Replicates torch.nn.init.kaiming_uniform_(tensor, a=sqrt(5)) for a
    # (num_centers, feat_dim) tensor: fan_in = feat_dim,
    # gain = sqrt(2 / (1 + a^2)) = 1/sqrt(3), bound = gain * sqrt(3/fan_in)
    # = 1 / sqrt(fan_in).
    bound = 1.0 / math.sqrt(feat_dim)
    return jax.random.uniform(
        key, (num_centers, feat_dim), dtype=dtype, minval=-bound, maxval=bound
    )


if __name__ == "__main__":
    key = jax.random.PRNGKey(0)
    k_feat, k_cent, k_feat2, k_cent2 = jax.random.split(key, 4)

    # Small shapes consistent with the module: batch=8, feat_dim=32, centers=16.
    batch, feat_dim, num_centers = 8, 32, 16
    feat = jax.random.normal(k_feat, (batch, feat_dim), dtype=jnp.float32)
    centers = init_centers(k_cent, num_centers, feat_dim)

    dist = jax.block_until_ready(centroid_euclidean_dist(feat, centers))
    ref = jnp.sum((feat[:, None, :] - centers[None, :, :]) ** 2, axis=-1)
    assert dist.shape == (batch, num_centers)
    assert jnp.allclose(dist, ref, rtol=1e-3, atol=1e-2), float(
        jnp.max(jnp.abs(dist - ref)))

    # Ragged shapes to exercise the padding / slicing path.
    b2, d2, c2 = 5, 70, 37
    feat2 = jax.random.normal(k_feat2, (b2, d2), dtype=jnp.float32)
    centers2 = init_centers(k_cent2, c2, d2)
    dist2 = jax.block_until_ready(centroid_euclidean_dist(feat2, centers2))
    ref2 = jnp.sum((feat2[:, None, :] - centers2[None, :, :]) ** 2, axis=-1)
    assert dist2.shape == (b2, c2)
    assert jnp.allclose(dist2, ref2, rtol=1e-3, atol=1e-2), float(
        jnp.max(jnp.abs(dist2 - ref2)))

    print("KERNEL_OK")
</pallas_src>

<mosaic_0001>
module attributes {stable_mosaic.version = 11 : i64} {
  func.func @_dist_kernel_single_k(%arg0: i32, %arg1: i32, %arg2: i32, %arg3: memref<8x128xf32, #tpu.memory_space<vmem>>, %arg4: memref<128x128xf32, #tpu.memory_space<vmem>>, %arg5: memref<8x1xf32, #tpu.memory_space<vmem>>, %arg6: memref<1x128xf32, #tpu.memory_space<vmem>>, %arg7: memref<8x128xf32, #tpu.memory_space<vmem>>) attributes {dimension_semantics = [#tpu.dimension_semantics<parallel>, #tpu.dimension_semantics<parallel>, #tpu.dimension_semantics<arbitrary>], iteration_bounds = array<i64: 1, 1, 1>, scalar_prefetch = 0 : i64, scratch_operands = 0 : i64, tpu.core_type = #tpu.core_type<tc>, window_params = [{transform_indices = @transform_0, window_bounds = array<i64: 8, 128>}, {transform_indices = @transform_1, window_bounds = array<i64: 128, 128>}, {transform_indices = @transform_2, window_bounds = array<i64: 8, 1>}, {transform_indices = @transform_3, window_bounds = array<i64: 1, 128>}, {transform_indices = @transform_4, window_bounds = array<i64: 8, 128>}]} {
    %c0 = arith.constant 0 : index
    %c0_0 = arith.constant 0 : index
    %0 = vector.load %arg3[%c0, %c0_0] : memref<8x128xf32, #tpu.memory_space<vmem>>, vector<8x128xf32>
    %c0_1 = arith.constant 0 : index
    %c0_2 = arith.constant 0 : index
    %1 = vector.load %arg4[%c0_1, %c0_2] : memref<128x128xf32, #tpu.memory_space<vmem>>, vector<128x128xf32>
    %cst = arith.constant dense<0.000000e+00> : vector<8x128xf32>
    %2 = tpu.matmul %0, %1, %cst {dimension_numbers = #tpu.dot_dimension_numbers<[1], [0], [0], [1], [0, 0, 1, 1], [], []>} : vector<8x128xf32>, vector<128x128xf32>, vector<8x128xf32> -> vector<8x128xf32>
    %c0_3 = arith.constant 0 : index
    %c0_4 = arith.constant 0 : index
    %3 = vector.load %arg5[%c0_3, %c0_4] : memref<8x1xf32, #tpu.memory_space<vmem>>, vector<8x1xf32>
    %c0_5 = arith.constant 0 : index
    %c0_6 = arith.constant 0 : index
    %4 = vector.load %arg6[%c0_5, %c0_6] : memref<1x128xf32, #tpu.memory_space<vmem>>, vector<1x128xf32>
    %5 = vector.broadcast %3 : vector<8x1xf32> to vector<8x128xf32>
    %6 = vector.broadcast %4 : vector<1x128xf32> to vector<8x128xf32>
    %7 = arith.addf %5, %6 : vector<8x128xf32>
    %cst_7 = arith.constant 2.000000e+00 : f32
    %8 = vector.broadcast %cst_7 : f32 to vector<8x128xf32>
    %9 = arith.mulf %8, %2 : vector<8x128xf32>
    %10 = arith.subf %7, %9 : vector<8x128xf32>
    %cst_8 = arith.constant 0.000000e+00 : f32
    %11 = vector.broadcast %cst_8 : f32 to vector<8x128xf32>
    %12 = arith.maximumf %10, %11 : vector<8x128xf32>
    %c0_9 = arith.constant 0 : index
    %c0_10 = arith.constant 0 : index
    %13 = vector.load %arg7[%c0_9, %c0_10] : memref<8x128xf32, #tpu.memory_space<vmem>>, vector<8x128xf32>
    tpu.vector_store %arg7[%c0_9, %c0_10], %12 {strides = array<i32>} : memref<8x128xf32, #tpu.memory_space<vmem>>, vector<8x128xf32>,
    return
  }
  func.func @transform_0(%arg0: i32, %arg1: i32, %arg2: i32) -> (i32, i32) {
    %c0_i32 = arith.constant 0 : i32
    return %arg0, %arg2 : i32, i32
  }
  func.func @transform_1(%arg0: i32, %arg1: i32, %arg2: i32) -> (i32, i32) {
    %c0_i32 = arith.constant 0 : i32
    return %arg2, %arg1 : i32, i32
  }
  func.func @transform_2(%arg0: i32, %arg1: i32, %arg2: i32) -> (i32, i32) {
    %c0_i32 = arith.constant 0 : i32
    %c0_i32_0 = arith.constant 0 : i32
    return %arg0, %c0_i32 : i32, i32
  }
  func.func @transform_3(%arg0: i32, %arg1: i32, %arg2: i32) -> (i32, i32) {
    %c0_i32 = arith.constant 0 : i32
    %c0_i32_0 = arith.constant 0 : i32
    return %c0_i32, %arg1 : i32, i32
  }
  func.func @transform_4(%arg0: i32, %arg1: i32, %arg2: i32) -> (i32, i32) {
    %c0_i32 = arith.constant 0 : i32
    return %arg0, %arg1 : i32, i32
  }
}

</mosaic_0001>

<bundles_post_ra>
// kernel: tpu_custom_call.1
= control target key start
LH: loop header
LB: loop body
LE: loop exit
PB: predicated region body
PF: predicated region fallthrough
CT: control target
= control target key end

     0   :  { %9 = vsyncpa [#allocation3], 0  ;;  %s352_s0 = inlined_call_operand.vmem [shape: f32[8,128], index: 0, kind: input, shape index: {}]   ;;  %s353_s1 = inlined_call_operand.hbm [shape: f32[128,128], index: 1, kind: input, shape index: {}]   ;;  %s354_s2 = inlined_call_operand.vmem [shape: f32[8,1], index: 2, kind: input, shape index: {}]   ;;  %s355_s3 = inlined_call_operand.vmem [shape: f32[1,128], index: 3, kind: input, shape index: {}]   ;;  %s356_s4 = inlined_call_operand.hbm [shape: f32[8,128], index: 4, kind: output, shape index: {}]  }
   0x1   :  { %10 = vsyncpa [#allocation4], 0  ;;  %s286_s15 = smov [#allocation2]   ;;  %s238_s19 = scalar_lea.hbm %s353_s1, 2048 }
   0x2   :  { %s18_s16 = sshll.u32 %s286_s15, 4  ;;  %p239_p0 = scmp.ne.s32.totalorder %s353_s1, %s238_s19  ;;  %s19_s16 = int_to_ptr.vmem [resolvable:$true] %s18_s16 }
   0x3   :  { %p242_p1 = scmp.lt.u32.totalorder %s238_s19, %s353_s1 }
   0x5   :  { %p244_p2 = pnand %p242_p1, %p239_p0 }
   0x7   :  { %247 = shalt.err (!%p244_p2)
}
   0x8   :  { %s248_s24 = scalar_lea.vmem %s19_s16, 2048  ;;  %p253_p4 = scmp.lt.s32.totalorder %s19_s16, %s19_s16 }
   0x9   :  { %p249_p3 = scmp.ne.s32.totalorder %s19_s16, %s248_s24  ;;  %p254_p5 = scmp.lt.s32.totalorder %s248_s24, %s248_s24 }
   0xb   :  { %p255_p6 = por %p254_p5, %p253_p4 }
   0xd   :  { %p256_p7 = pnand %p255_p6, %p249_p3 }
   0xf   :  { %259 = shalt.err (!%p256_p7)
}
  0x10   :  { %s287_s25 = smov 128   ;;  %s288_s26 = smov 8  }
  0x11   :  { %24 = dma.hbm_to_vmem [thread:$0]  %s353_s1, 2048, %s19_s16, [#allocation3], %s287_s25, %s287_s25, %s288_s26  }
  0x12   :  { %282 = dma.done.wait [#allocation3], 2048  }
  0x13   :  { %283 = vsyncadd [#allocation3], 4294965248  ;;  %v289_v0 = vmov 0.0|0.0   ;;  %vm290_vm0 = vmmov 0   ;;  %v291_v1 = vmov 0.0   ;;  %v292_v2 = vmov 0  }
  0x14   :  { %205 = vmatprep.subr.bf16.mxu0 %v289_v0  ;;  %202 = vmatprep.mubr.msk.f32.mxu0 %vm290_vm0, %v291_v1  ;;  %v33_v3 = vld [vmem:[#allocation2] sm:$0xff]  ;;  %v34_v4 = vld [vmem:[#allocation2 + $0x8] sm:$0xff]  ;;  %v35_v5 = vld [vmem:[#allocation2 + $0x10] sm:$0xff]  ;;  %s293_s7 = smov [#allocation5]  }
  0x15   :  { %237 = vset.pattern.permute.xlu0 %v292_v2  ;;  %v206_v6 = vpack.c.bf16 %v34_v4, %v33_v3  ;;  %v36_v7 = vld [vmem:[#allocation2 + $0x18] sm:$0xff]  ;;  %v37_v9 = vld [vmem:[#allocation2 + $0x20] sm:$0xff]  ;;  %v38_v10 = vld [vmem:[#allocation2 + $0x28] sm:$0xff]  ;;  %s143_s8 = sshll.u32 %s293_s7, 4  ;;  %s144_s8 = int_to_ptr.vmem [resolvable:$true] %s143_s8 }
  0x16   :  { %v209_v8 = vpack.c.bf16 %v36_v7, %v35_v5  ;;  %v119_v11 = vld [vmem:[%s354_s2] sm:$0xff]  ;;  %v212_v12 = vpack.c.bf16 %v38_v10, %v37_v9  ;;  %v39_v13 = vld [vmem:[#allocation2 + $0x30] sm:$0xff]  ;;  %v40_v14 = vld [vmem:[#allocation2 + $0x38] sm:$0xff]  ;;  %s260_s9 = scalar_lea.vmem %s144_s8, 128  ;;  %p265_p9 = scmp.lt.s32.totalorder %s144_s8, %s144_s8 }
  0x17   :  { %207 = vmatpush3.bf16.msra.mxu0 %v206_v6  ;;  %123 = vperm.xlu0 %237, %v119_v11   ;;  %v215_v15 = vpack.c.bf16 %v40_v14, %v39_v13  ;;  %v41_v16 = vld [vmem:[#allocation2 + $0x40] sm:$0xff]  ;;  %v42_v17 = vld [vmem:[#allocation2 + $0x48] sm:$0xff]  ;;  %v43_v19 = vld [vmem:[#allocation2 + $0x50] sm:$0xff]  ;;  %p261_p8 = scmp.ne.s32.totalorder %s144_s8, %s260_s9  ;;  %p266_p10 = scmp.lt.s32.totalorder %s260_s9, %s260_s9 }
  0x18   :  { %208 = vmatprep.subr.bf16.mxu0 %v289_v0  ;;  %v218_v18 = vpack.c.bf16 %v42_v17, %v41_v16  ;;  %v44_v20 = vld [vmem:[#allocation2 + $0x58] sm:$0xff]  ;;  %v45_v22 = vld [vmem:[#allocation2 + $0x60] sm:$0xff]  ;;  %v46_v23 = vld [vmem:[#allocation2 + $0x68] sm:$0xff] }
  0x19   :  { %v221_v21 = vpack.c.bf16 %v44_v20, %v43_v19  ;;  %v224_v24 = vpack.c.bf16 %v46_v23, %v45_v22  ;;  %v47_v25 = vld [vmem:[#allocation2 + $0x70] sm:$0xff]  ;;  %v48_v26 = vld [vmem:[#allocation2 + $0x78] sm:$0xff]  ;;  %v32_v28 = vld [vmem:[%s352_s0] sm:$0xff]  ;;  %p267_p11 = por %p266_p10, %p265_p9 }
  0x1a   :  { %v227_v27 = vpack.c.bf16 %v48_v26, %v47_v25  ;;  %v152_v29 = vld [vmem:[%s355_s3] ss:$0 sm:$0xff] }
  0x1b   :  { %210 = vmatpush3.bf16.msra.mxu0 %v209_v8  ;;  %p268_p12 = pnand %p267_p11, %p261_p8 }
  0x1c   :  { %211 = vmatprep.subr.bf16.mxu0 %v289_v0 }
  0x1f   :  { %213 = vmatpush3.bf16.msra.mxu0 %v212_v12 }
  0x20   :  { %214 = vmatprep.subr.bf16.mxu0 %v289_v0 }
  0x23   :  { %216 = vmatpush3.bf16.msra.mxu0 %v215_v15 }
  0x24   :  { %217 = vmatprep.subr.bf16.mxu0 %v289_v0 }
  0x27   :  { %219 = vmatpush3.bf16.msra.mxu0 %v218_v18 }
  0x28   :  { %220 = vmatprep.subr.bf16.mxu0 %v289_v0 }
  0x2b   :  { %222 = vmatpush3.bf16.msra.mxu0 %v221_v21 }
  0x2c   :  { %223 = vmatprep.subr.bf16.mxu0 %v289_v0 }
  0x2f   :  { %225 = vmatpush3.bf16.msra.mxu0 %v224_v24 }
  0x30   :  { %226 = vmatprep.subr.bf16.mxu0 %v289_v0 }
  0x33   :  { %228 = vmatpush3.bf16.msra.mxu0 %v227_v27 }
  0x36   :  { %203 = vmatmul.mubr.f32.vlgmr.msra.gmra.mrb[0].mxu0 %v32_v28 }
  0x96   :  { %v124_v30 = vpop.permute.xlu0 %123 }
  0x97   :  { %v132_v31 = vadd.f32 %v152_v29, %v124_v30 }
 0x109   :  { %v115_v32 = vpop.f32.mrb[0].mxu0 }
 0x10a   :  { %v133_v33 = vmul.f32 2.0, %v115_v32  ;;  %v204_v34 = vpop.f32.mrb[1].mxu0 }
 0x10c   :  { %v134_v35 = vsub.f32 %v132_v31, %v133_v33 }
 0x10e   :  { %v135_v36 = vmax.f32 %v134_v35, 0.0 }
 0x110   :  { %136 = vst [vmem:[#allocation5] sm:$0xff] %v135_v36 }
 0x111   :  { %271 = shalt.err (!%p268_p12)
}
 0x112   :  { %s272_s10 = scalar_lea.hbm %s356_s4, 128 }
 0x113   :  { %p273_p13 = scmp.ne.s32.totalorder %s356_s4, %s272_s10  ;;  %p276_p0 = scmp.lt.u32.totalorder %s272_s10, %s356_s4 }
 0x115   :  { %p278_p1 = pnand %p276_p0, %p273_p13 }
 0x117   :  { %281 = shalt.err (!%p278_p1)
}
 0x118   :  { %146 = dma.vmem_to_hbm [thread:$0]  %s144_s8, 128, %s356_s4, [#allocation4]  }
 0x119   :  { %284 = dma.done.wait [#allocation4], 128  }
 0x11a   :  { %285 = vsyncadd [#allocation4], 4294967168 }
 0x11b   :  { %150 = vsyncpa [#allocation3], 1 }
 0x11c   :  { %151 = vsyncpa [#allocation4], 1 }

</bundles_post_ra>
